<compile_context>
chip_gen: v7x
topology: tpu7x:2x2x1
jax: 0.10.0
libtpu: 0.0.40
codegen_flags: <defaults>
</compile_context>

<pallas_src>
import jax
import jax.numpy as jnp
from jax.experimental import pallas as pl
from jax.experimental.pallas import tpu as pltpu


def linear_kernel(x_ref, w_ref, b_ref, o_ref):
    # x_ref: (TILE_N, ndim) VMEM    w_ref: (1, ndim) VMEM
    # b_ref: (1,) SMEM              o_ref: (1, TILE_N) VMEM (lane-dense)
    prod = x_ref[...] * w_ref[...]              # VPU broadcast multiply
    rowsum = jnp.sum(prod, axis=1)              # cross-lane row reduce -> (TILE_N,)
    o_ref[...] = (rowsum + b_ref[0])[None, :].astype(o_ref.dtype)


def _choose_tile(n, ndim, *, max_tile=512, max_block_bytes=8 << 20):
    """Rows per grid step: big enough to pipeline, small enough that the
    double-buffered x block fits comfortably in VMEM even on v7x."""
    bytes_per_row = 4 * max(ndim, 1)
    cap = max(128, (max_block_bytes // (2 * bytes_per_row)) // 128 * 128)
    tile = min(max_tile, cap)
    padded_small = ((n + 7) // 8) * 8            # sublane multiple
    if padded_small <= tile:
        return padded_small, padded_small        # single tile == full padded array
    tile = max(128, (tile // 128) * 128)         # lane multiple for dense stores
    padded_n = ((n + tile - 1) // tile) * tile
    return tile, padded_n


def linear_forward(x, weight, bias):
    """x: (N, ndim), weight: (ndim, 1), bias: (1,) -> (N, 1)."""
    n, ndim = x.shape
    tile_n, padded_n = _choose_tile(n, ndim)
    num_tiles = padded_n // tile_n

    if padded_n != n:
        x = jnp.pad(x, ((0, padded_n - n), (0, 0)))
    w_row = weight.reshape(1, ndim)              # lane-aligned broadcast row

    out_row = pl.pallas_call(
        linear_kernel,
        out_shape=jax.ShapeDtypeStruct((1, padded_n), jnp.float32),
        grid_spec=pltpu.PrefetchScalarGridSpec(
            num_scalar_prefetch=0,
            grid=(num_tiles,),
            in_specs=[
                pl.BlockSpec((tile_n, ndim), lambda i: (i, 0)),      # x row tile
                pl.BlockSpec((1, ndim), lambda i: (0, 0)),           # weight row (resident)
                pl.BlockSpec(memory_space=pltpu.MemorySpace.SMEM),   # bias scalar
            ],
            out_specs=pl.BlockSpec((1, tile_n), lambda i: (0, i)),
        ),
        compiler_params=pltpu.CompilerParams(
            dimension_semantics=("parallel",)),
        cost_estimate=pl.CostEstimate(
            flops=2 * padded_n * ndim,
            transcendentals=0,
            bytes_accessed=4 * (padded_n * ndim + ndim + padded_n)),
    )(x, w_row, bias)

    return out_row.reshape(-1)[:n].reshape(n, 1)


if __name__ == "__main__":
    key = jax.random.PRNGKey(0)
    kx, kw, kb, kx2 = jax.random.split(key, 4)

    # Shapes from the PyTorch module: x = randn(4, 5), weight (5, 1), bias (1,)
    ndim = 5
    x = jax.random.normal(kx, (4, ndim), dtype=jnp.float32)
    weight = jax.random.normal(kw, (ndim, 1), dtype=jnp.float32)
    bias = jax.random.normal(kb, (1,), dtype=jnp.float32)

    out = jax.block_until_ready(linear_forward(x, weight, bias))
    ref = x @ weight + bias
    assert out.shape == (4, 1)
    assert jnp.allclose(out, ref, atol=1e-5, rtol=1e-5)

    # Larger, ragged N exercises the tiled / padded multi-block pipelined path.
    x_big = jax.random.normal(kx2, (1000, ndim), dtype=jnp.float32)
    out_big = jax.block_until_ready(linear_forward(x_big, weight, bias))
    ref_big = x_big @ weight + bias
    assert out_big.shape == (1000, 1)
    assert jnp.allclose(out_big, ref_big, atol=1e-5, rtol=1e-5)

    print("KERNEL_OK")
</pallas_src>

<mosaic_0001>
module attributes {stable_mosaic.version = 11 : i64} {
  func.func @linear_kernel(%arg0: i32, %arg1: memref<8x5xf32, #tpu.memory_space<vmem>>, %arg2: memref<1x5xf32, #tpu.memory_space<vmem>>, %arg3: memref<1xf32, #tpu.memory_space<smem>>, %arg4: memref<1x8xf32, #tpu.memory_space<vmem>>) attributes {dimension_semantics = [#tpu.dimension_semantics<parallel>], iteration_bounds = array<i64: 1>, scalar_prefetch = 0 : i64, scratch_operands = 0 : i64, tpu.core_type = #tpu.core_type<tc>, window_params = [{transform_indices = @transform_0, window_bounds = array<i64: 8, 5>}, {pipeline_mode = #tpu.pipeline_mode<synchronous>, transform_indices = @transform_1, window_bounds = array<i64: 1, 5>}, {transform_indices = @transform_2, window_bounds = array<i64: 1>}, {transform_indices = @transform_3, window_bounds = array<i64: 1, 8>}]} {
    %c0 = arith.constant 0 : index
    %c0_0 = arith.constant 0 : index
    %0 = vector.load %arg1[%c0, %c0_0] : memref<8x5xf32, #tpu.memory_space<vmem>>, vector<8x5xf32>
    %c0_1 = arith.constant 0 : index
    %c0_2 = arith.constant 0 : index
    %1 = vector.load %arg2[%c0_1, %c0_2] : memref<1x5xf32, #tpu.memory_space<vmem>>, vector<1x5xf32>
    %2 = vector.broadcast %1 : vector<1x5xf32> to vector<8x5xf32>
    %3 = arith.mulf %0, %2 : vector<8x5xf32>
    %cst = arith.constant dense<0.000000e+00> : vector<8xf32>
    %4 = vector.multi_reduction <add>, %3, %cst [1] : vector<8x5xf32> to vector<8xf32>
    %c0_3 = arith.constant 0 : index
    %5 = memref.load %arg3[%c0_3] : memref<1xf32, #tpu.memory_space<smem>>
    %6 = vector.broadcast %5 : f32 to vector<8xf32>
    %7 = arith.addf %4, %6 : vector<8xf32>
    %8 = vector.shape_cast %7 : vector<8xf32> to vector<1x8xf32>
    %c0_4 = arith.constant 0 : index
    %c0_5 = arith.constant 0 : index
    %9 = vector.load %arg4[%c0_4, %c0_5] : memref<1x8xf32, #tpu.memory_space<vmem>>, vector<1x8xf32>
    tpu.vector_store %arg4[%c0_4, %c0_5], %8 {strides = array<i32>} : memref<1x8xf32, #tpu.memory_space<vmem>>, vector<1x8xf32>,
    return
  }
  func.func @transform_0(%arg0: i32) -> (i32, i32) {
    %c0_i32 = arith.constant 0 : i32
    %c0_i32_0 = arith.constant 0 : i32
    return %arg0, %c0_i32 : i32, i32
  }
  func.func @transform_1(%arg0: i32) -> (i32, i32) {
    %c0_i32 = arith.constant 0 : i32
    %c0_i32_0 = arith.constant 0 : i32
    %c0_i32_1 = arith.constant 0 : i32
    return %c0_i32, %c0_i32_0 : i32, i32
  }
  func.func @transform_2(%arg0: i32) -> i32 {
    %c0_i32 = arith.constant 0 : i32
    %c0_i32_0 = arith.constant 0 : i32
    return %c0_i32 : i32
  }
  func.func @transform_3(%arg0: i32) -> (i32, i32) {
    %c0_i32 = arith.constant 0 : i32
    %c0_i32_0 = arith.constant 0 : i32
    return %c0_i32, %arg0 : i32, i32
  }
}

</mosaic_0001>

<bundles_post_ra>
// kernel: tpu_custom_call.1
= control target key start
LH: loop header
LB: loop body
LE: loop exit
PB: predicated region body
PF: predicated region fallthrough
CT: control target
= control target key end

     0   :  { %9 = vsyncpa [#allocation4], 0  ;;  %s172_s0 = inlined_call_operand.hbm [shape: f32[8,5], index: 0, kind: input, shape index: {}]   ;;  %s173_s1 = inlined_call_operand.vmem [shape: f32[1,5], index: 1, kind: input, shape index: {}]   ;;  %s174_s2 = inlined_call_operand.<no memory space> [shape: f32[1], index: 2, kind: input, shape index: {}]   ;;  %s175_s3 = inlined_call_operand.hbm [shape: f32[1,8], index: 3, kind: output, shape index: {}]  }
   0x1   :  { %10 = vsyncpa [#allocation5], 0  ;;  %s120_s12 = smov [#allocation3]   ;;  %s72_s16 = scalar_lea.hbm %s172_s0, 128 }
   0x2   :  { %s17_s13 = sshll.u32 %s120_s12, 4  ;;  %p73_p0 = scmp.ne.s32.totalorder %s172_s0, %s72_s16  ;;  %s18_s13 = int_to_ptr.vmem [resolvable:$true] %s17_s13 }
   0x3   :  { %p76_p1 = scmp.lt.u32.totalorder %s72_s16, %s172_s0 }
   0x5   :  { %p78_p2 = pnand %p76_p1, %p73_p0 }
   0x7   :  { %81 = shalt.err (!%p78_p2)
}
   0x8   :  { %s82_s21 = scalar_lea.vmem %s18_s13, 128  ;;  %p87_p4 = scmp.lt.s32.totalorder %s18_s13, %s18_s13 }
   0x9   :  { %p83_p3 = scmp.ne.s32.totalorder %s18_s13, %s82_s21  ;;  %p88_p5 = scmp.lt.s32.totalorder %s82_s21, %s82_s21 }
   0xb   :  { %p89_p6 = por %p88_p5, %p87_p4 }
   0xd   :  { %p90_p7 = pnand %p89_p6, %p83_p3 }
   0xf   :  { %93 = shalt.err (!%p90_p7)
}
  0x10   :  { %20 = dma.hbm_to_vmem [thread:$0]  %s172_s0, 128, %s18_s13, [#allocation4]  }
  0x11   :  { %116 = dma.done.wait [#allocation4], 128  }
  0x12   :  { %117 = vsyncadd [#allocation4], 4294967168  ;;  %v28_v0 = vld [vmem:[#allocation3] sm:$0xff]  ;;  %vm37_vm0 = vcmask 39936   ;;  %v45_v4 = vlaneseq  ;;  %v42_v7 = vstv %s174_s2  ;;  %s121_s0 = smov [#allocation6]   ;;  %vm52_vm1 = vcmask 57344  }
  0x13   :  { %v69_v1 = vld [vmem:[%s173_s1] ss:$0 sm:$0xff]  ;;  %s60_s28 = sshll.u32 %s121_s0, 4  ;;  %s61_s28 = int_to_ptr.vmem [resolvable:$true] %s60_s28 }
  0x14   :  { %v36_v2 = vmul.f32 %v69_v1, %v28_v0  ;;  %v46_v5 = vand.u32 127, %v45_v4  ;;  %v48_v6 = vshrl.u32 %v45_v4, 7  ;;  %s94_s1 = scalar_lea.vmem %s61_s28, 16  ;;  %s98_s29 = scalar_lea.vmem %s61_s28, 32 }
  0x15   :  { %p95_p8 = scmp.ne.s32.totalorder %s61_s28, %s94_s1  ;;  %p99_p9 = scmp.lt.s32.totalorder %s61_s28, %s61_s28 }
  0x16   :  { %v38_v3 = vsel %vm37_vm0, %v36_v2, 0.0  ;;  %v49_v8 = vsub.s32 %v46_v5, %v48_v6  ;;  %p100_p10 = scmp.lt.s32.totalorder %s98_s29, %s94_s1 }
  0x17   :  { %39 = vadd.xlane.f32.xlu0 %v38_v3 }
  0x18   :  { %p101_p11 = por %p100_p10, %p99_p9 }
  0x1a   :  { %p102_p12 = pnand %p101_p11, %p95_p8 }
  0xa4   :  { %v40_v9 = vpop.xlane.xlu0 %39 }
  0xa5   :  { %v43_v10 = vadd.f32 %v42_v7, %v40_v9 }
  0xa7   :  { %v50_v11 = vrot.slane %v43_v10, %v49_v8 }
  0xa9   :  { %53 = vst.msk [vmem:[#allocation6] sm:$0x1] %vm52_vm1, %v50_v11 }
  0xaa   :  { %105 = shalt.err (!%p102_p12)
}
  0xab   :  { %s106_s2 = scalar_lea.hbm %s175_s3, 16 }
  0xac   :  { %p107_p13 = scmp.ne.s32.totalorder %s175_s3, %s106_s2  ;;  %p110_p0 = scmp.lt.u32.totalorder %s106_s2, %s175_s3 }
  0xae   :  { %p112_p1 = pnand %p110_p0, %p107_p13 }
  0xb0   :  { %115 = shalt.err (!%p112_p1)
}
  0xb1   :  { %63 = dma.vmem_to_hbm [thread:$0]  %s61_s28, 16, %s175_s3, [#allocation5]  }
  0xb2   :  { %118 = dma.done.wait [#allocation5], 16  }
  0xb3   :  { %119 = vsyncadd [#allocation5], 4294967280 }
  0xb4   :  { %67 = vsyncpa [#allocation4], 1 }
  0xb5   :  { %68 = vsyncpa [#allocation5], 1 }

</bundles_post_ra>
